<compile_context>
chip_gen: v6e
topology: v6e:2x2x1
jax: 0.10.0
libtpu: 0.0.40
codegen_flags: <defaults>
</compile_context>

<pallas_src>
import functools

import jax
import jax.numpy as jnp
from jax.experimental import pallas as pl
from jax.experimental.pallas import tpu as pltpu


def _round_up(x: int, m: int) -> int:
    return ((x + m - 1) // m) * m


def _cdiv(a: int, b: int) -> int:
    return -(-a // b)


def _pick_tn(hp: int, max_tn: int) -> int:
    """Largest multiple of 128 that divides hp (hp is 128-aligned), <= max_tn."""
    for cand in range(max_tn, 127, -128):
        if hp % cand == 0:
            return cand
    return 128


def _residual_linear_kernel(x_ref, w_ref, b_ref, o_ref, acc_ref, *, mxu_dtype):
    j = pl.program_id(1)
    k = pl.program_id(2)

    x_tile = x_ref[...]                                   # (tm, tk), original dtype
    lhs = x_tile if mxu_dtype is None else x_tile.astype(mxu_dtype)
    part = jnp.dot(lhs, w_ref[...], preferred_element_type=jnp.float32)

    @pl.when(k == 0)
    def _first():
        # Direct assignment: saves a (tm, tn) zero fill + extra f32 add.
        acc_ref[...] = part

    @pl.when(k > 0)
    def _accum():
        acc_ref[...] += part

    # Residual: tk == tn, so the (i, k == j) x tile is exactly the (i, j)
    # output block.  Added exactly once per output tile, at full f32 precision.
    @pl.when(k == j)
    def _residual():
        acc_ref[...] += x_tile.astype(jnp.float32)

    @pl.when(k == pl.num_programs(2) - 1)
    def _epilogue():
        out = acc_ref[...] + b_ref[...].astype(jnp.float32)
        o_ref[...] = out.astype(o_ref.dtype)


def prepare_params(weight, bias, *, mxu_dtype=jnp.bfloat16):
    """One-time weight/bias prep (hoisted out of the per-forward path).

    weight: (H_out, H_in) torch nn.Linear convention; bias: (H_out,).
    Returns (w_t, b2d): pre-transposed to (H_in, H_out), pre-cast to the MXU
    dtype, and pre-padded to a 128-aligned hidden size, so each forward call
    pays no HBM-level transpose/cast/pad for the weight.
    """
    h_out, h_in = weight.shape
    assert h_out == h_in, "Residual(nn.Linear) requires a square weight"
    h = h_in
    hp = _round_up(h, 128)

    w_t = weight.T                                        # x @ w_t == x @ W^T
    if mxu_dtype is not None:
        w_t = w_t.astype(mxu_dtype)
    b2d = bias.reshape(1, h).astype(jnp.float32)

    if hp != h:
        w_t = jnp.pad(w_t, ((0, hp - h), (0, hp - h)))
        b2d = jnp.pad(b2d, ((0, 0), (0, hp - h)))
    return w_t, b2d


@functools.partial(jax.jit, static_argnames=("mxu_dtype", "max_tm", "max_tn"))
def residual_forward(x_bsh, w_t, b2d, *, mxu_dtype=jnp.bfloat16,
                     max_tm=512, max_tn=512):
    """Mirror of torch `Residual(nn.Linear(H, H))`: x @ W^T + b + x.

    x_bsh : (batch, seq, hidden) activations (kept in their own dtype in HBM;
            cast to `mxu_dtype` inside the kernel for the MXU).
    w_t, b2d : outputs of prepare_params().
    """
    B, S, H = x_bsh.shape
    Hp = w_t.shape[0]
    M = B * S
    x2d = x_bsh.reshape(M, H)

    # --- tile selection (Python ints at trace time) -------------------------
    tn = _pick_tn(Hp, max_tn)          # lane-dense output tile, divides Hp
    tk = tn                            # k == j residual reuse requires tk == tn
    nb_m = max(1, _cdiv(M, max_tm))
    tm = _round_up(_cdiv(M, nb_m), 8)  # <= ~max_tm, minimal row padding
    Mp = tm * nb_m

    if (Mp, Hp) != (M, H):
        x2d = jnp.pad(x2d, ((0, Mp - M), (0, Hp - H)))

    grid = (Mp // tm, Hp // tn, Hp // tk)

    # VMEM budget: double-buffered x / W / bias / out tiles + f32 accumulator.
    x_bytes = jnp.dtype(x2d.dtype).itemsize
    w_bytes = jnp.dtype(w_t.dtype).itemsize
    est = (2 * (tm * tk * x_bytes + tk * tn * w_bytes + tn * 4 + tm * tn * x_bytes)
           + tm * tn * 4)
    vmem_limit = int(min(64 * 1024 * 1024, max(32 * 1024 * 1024, 2 * est)))

    out = pl.pallas_call(
        functools.partial(_residual_linear_kernel, mxu_dtype=mxu_dtype),
        out_shape=jax.ShapeDtypeStruct((Mp, Hp), x2d.dtype),
        grid_spec=pltpu.PrefetchScalarGridSpec(
            num_scalar_prefetch=0,
            grid=grid,
            in_specs=[
                # x: matmul operand AND residual (single stream, see kernel)
                pl.BlockSpec((tm, tk), lambda i, j, k: (i, k)),
                # W^T, pre-prepped.  If weight DMA is exposed (small M,
                # memory-bound), add pipeline_mode=pl.Buffered(3) here.
                pl.BlockSpec((tk, tn), lambda i, j, k: (k, j)),
                # bias
                pl.BlockSpec((1, tn), lambda i, j, k: (0, j)),
            ],
            out_specs=pl.BlockSpec((tm, tn), lambda i, j, k: (i, j)),
            scratch_shapes=[pltpu.VMEM((tm, tn), jnp.float32)],
        ),
        compiler_params=pltpu.CompilerParams(
            dimension_semantics=("parallel", "parallel", "arbitrary"),
            vmem_limit_bytes=vmem_limit,
        ),
    )(x2d, w_t, b2d)

    if (Mp, Hp) != (M, H):
        out = out[:M, :H]
    return out.reshape(B, S, H)


if __name__ == "__main__":
    # Deterministic parameters and small inputs (kernel pads hidden to 128
    # lanes internally; at production sizes the tiled grid pipelines).
    batch, seq, hidden = 2, 8, 32
    key = jax.random.PRNGKey(0)
    kx, kw, kb = jax.random.split(key, 3)

    x = jax.random.normal(kx, (batch, seq, hidden), dtype=jnp.float32)
    # nn.Linear(hidden, hidden) parameter shapes: weight (H, H), bias (H,)
    weight = jax.random.normal(kw, (hidden, hidden), dtype=jnp.float32) * 0.05
    bias = jax.random.normal(kb, (hidden,), dtype=jnp.float32) * 0.05

    # Pure-JAX reference of Residual semantics: module(x) + x
    ref = jnp.einsum("bsh,oh->bso", x, weight) + bias + x

    # Default path: bf16 MXU operands, f32 accumulate + f32 bias/residual.
    w_bf16, b_prepped = prepare_params(weight, bias, mxu_dtype=jnp.bfloat16)
    out = residual_forward(x, w_bf16, b_prepped, mxu_dtype=jnp.bfloat16)
    jax.block_until_ready(out)
    assert out.shape == x.shape
    assert jnp.allclose(out, ref, atol=2e-2, rtol=2e-2), "bf16 path mismatch"

    # Exact-semantics check: full-f32 MXU path at tight tolerance.
    w_f32, b_prepped32 = prepare_params(weight, bias, mxu_dtype=None)
    out32 = residual_forward(x, w_f32, b_prepped32, mxu_dtype=None)
    jax.block_until_ready(out32)
    assert jnp.allclose(out32, ref, atol=1e-5, rtol=1e-5), "f32 path mismatch"

    print("KERNEL_OK")
</pallas_src>

<mosaic_0001>
module attributes {stable_mosaic.version = 11 : i64} {
  func.func @_residual_linear_kernel(%arg0: i32, %arg1: i32, %arg2: i32, %arg3: memref<16x128xf32, #tpu.memory_space<vmem>>, %arg4: memref<128x128xbf16, #tpu.memory_space<vmem>>, %arg5: memref<1x128xf32, #tpu.memory_space<vmem>>, %arg6: memref<16x128xf32, #tpu.memory_space<vmem>>, %arg7: memref<16x128xf32, #tpu.memory_space<vmem>>) attributes {dimension_semantics = [#tpu.dimension_semantics<parallel>, #tpu.dimension_semantics<parallel>, #tpu.dimension_semantics<arbitrary>], iteration_bounds = array<i64: 1, 1, 1>, scalar_prefetch = 0 : i64, scratch_operands = 1 : i64, tpu.core_type = #tpu.core_type<tc>, window_params = [{transform_indices = @transform_0, window_bounds = array<i64: 16, 128>}, {transform_indices = @transform_1, window_bounds = array<i64: 128, 128>}, {transform_indices = @transform_2, window_bounds = array<i64: 1, 128>}, {transform_indices = @transform_3, window_bounds = array<i64: 16, 128>}]} {
    %c0 = arith.constant 0 : index
    %c0_0 = arith.constant 0 : index
    %0 = vector.load %arg3[%c0, %c0_0] : memref<16x128xf32, #tpu.memory_space<vmem>>, vector<16x128xf32>
    %1 = arith.truncf %0 : vector<16x128xf32> to vector<16x128xbf16>
    %c0_1 = arith.constant 0 : index
    %c0_2 = arith.constant 0 : index
    %2 = vector.load %arg4[%c0_1, %c0_2] : memref<128x128xbf16, #tpu.memory_space<vmem>>, vector<128x128xbf16>
    %cst = arith.constant dense<0.000000e+00> : vector<16x128xf32>
    %3 = tpu.matmul %1, %2, %cst {dimension_numbers = #tpu.dot_dimension_numbers<[1], [0], [0], [1], [0, 0, 1, 1], [], []>} : vector<16x128xbf16>, vector<128x128xbf16>, vector<16x128xf32> -> vector<16x128xf32>
    %c0_i32 = arith.constant 0 : i32
    %4 = arith.cmpi eq, %arg2, %c0_i32 : i32
    %5 = arith.extui %4 : i1 to i32
    %c0_i32_3 = arith.constant 0 : i32
    %6 = arith.cmpi ne, %5, %c0_i32_3 : i32
    scf.if %6 {
      %c0_9 = arith.constant 0 : index
      %c0_10 = arith.constant 0 : index
      %16 = vector.load %arg7[%c0_9, %c0_10] : memref<16x128xf32, #tpu.memory_space<vmem>>, vector<16x128xf32>
      tpu.vector_store %arg7[%c0_9, %c0_10], %3 {strides = array<i32>} : memref<16x128xf32, #tpu.memory_space<vmem>>, vector<16x128xf32>,
    } else {
    }
    %c0_i32_4 = arith.constant 0 : i32
    %7 = arith.cmpi sgt, %arg2, %c0_i32_4 : i32
    %8 = arith.extui %7 : i1 to i32
    %c0_i32_5 = arith.constant 0 : i32
    %9 = arith.cmpi ne, %8, %c0_i32_5 : i32
    scf.if %9 {
      %c0_9 = arith.constant 0 : index
      %c0_10 = arith.constant 0 : index
      %16 = vector.load %arg7[%c0_9, %c0_10] : memref<16x128xf32, #tpu.memory_space<vmem>>, vector<16x128xf32>
      %17 = arith.addf %16, %3 : vector<16x128xf32>
      %c0_11 = arith.constant 0 : index
      %c0_12 = arith.constant 0 : index
      %18 = vector.load %arg7[%c0_11, %c0_12] : memref<16x128xf32, #tpu.memory_space<vmem>>, vector<16x128xf32>
      tpu.vector_store %arg7[%c0_11, %c0_12], %17 {strides = array<i32>} : memref<16x128xf32, #tpu.memory_space<vmem>>, vector<16x128xf32>,
    } else {
    }
    %10 = arith.cmpi eq, %arg2, %arg1 : i32
    %11 = arith.extui %10 : i1 to i32
    %c0_i32_6 = arith.constant 0 : i32
    %12 = arith.cmpi ne, %11, %c0_i32_6 : i32
    scf.if %12 {
      %c0_9 = arith.constant 0 : index
      %c0_10 = arith.constant 0 : index
      %16 = vector.load %arg7[%c0_9, %c0_10] : memref<16x128xf32, #tpu.memory_space<vmem>>, vector<16x128xf32>
      %17 = arith.addf %16, %0 : vector<16x128xf32>
      %c0_11 = arith.constant 0 : index
      %c0_12 = arith.constant 0 : index
      %18 = vector.load %arg7[%c0_11, %c0_12] : memref<16x128xf32, #tpu.memory_space<vmem>>, vector<16x128xf32>
      tpu.vector_store %arg7[%c0_11, %c0_12], %17 {strides = array<i32>} : memref<16x128xf32, #tpu.memory_space<vmem>>, vector<16x128xf32>,
    } else {
    }
    %c0_i32_7 = arith.constant 0 : i32
    %13 = arith.cmpi eq, %arg2, %c0_i32_7 : i32
    %14 = arith.extui %13 : i1 to i32
    %c0_i32_8 = arith.constant 0 : i32
    %15 = arith.cmpi ne, %14, %c0_i32_8 : i32
    scf.if %15 {
      %c0_9 = arith.constant 0 : index
      %c0_10 = arith.constant 0 : index
      %16 = vector.load %arg7[%c0_9, %c0_10] : memref<16x128xf32, #tpu.memory_space<vmem>>, vector<16x128xf32>
      %c0_11 = arith.constant 0 : index
      %c0_12 = arith.constant 0 : index
      %17 = vector.load %arg5[%c0_11, %c0_12] : memref<1x128xf32, #tpu.memory_space<vmem>>, vector<1x128xf32>
      %18 = vector.broadcast %17 : vector<1x128xf32> to vector<16x128xf32>
      %19 = arith.addf %16, %18 : vector<16x128xf32>
      %c0_13 = arith.constant 0 : index
      %c0_14 = arith.constant 0 : index
      %20 = vector.load %arg6[%c0_13, %c0_14] : memref<16x128xf32, #tpu.memory_space<vmem>>, vector<16x128xf32>
      tpu.vector_store %arg6[%c0_13, %c0_14], %19 {strides = array<i32>} : memref<16x128xf32, #tpu.memory_space<vmem>>, vector<16x128xf32>,
    } else {
    }
    return
  }
  func.func @transform_0(%arg0: i32, %arg1: i32, %arg2: i32) -> (i32, i32) {
    %c0_i32 = arith.constant 0 : i32
    return %arg0, %arg2 : i32, i32
  }
  func.func @transform_1(%arg0: i32, %arg1: i32, %arg2: i32) -> (i32, i32) {
    %c0_i32 = arith.constant 0 : i32
    return %arg2, %arg1 : i32, i32
  }
  func.func @transform_2(%arg0: i32, %arg1: i32, %arg2: i32) -> (i32, i32) {
    %c0_i32 = arith.constant 0 : i32
    %c0_i32_0 = arith.constant 0 : i32
    return %c0_i32, %arg1 : i32, i32
  }
  func.func @transform_3(%arg0: i32, %arg1: i32, %arg2: i32) -> (i32, i32) {
    %c0_i32 = arith.constant 0 : i32
    return %arg0, %arg1 : i32, i32
  }
}

</mosaic_0001>

<bundles_post_ra>
// kernel: residual_forward.1
= control target key start
LH: loop header
LB: loop body
LE: loop exit
PB: predicated region body
PF: predicated region fallthrough
CT: control target
= control target key end

     0   :  { %8 = vsyncpa [#allocation4], 0  ;;  %s257_s12 = smov [#allocation3]   ;;  %s300_s0 = inlined_call_operand.vmem [shape: f32[16,128], index: 0, kind: input, shape index: {}]   ;;  %s301_s1 = inlined_call_operand.hbm [shape: bf16[128,128], index: 1, kind: input, shape index: {}]   ;;  %s302_s2 = inlined_call_operand.vmem [shape: f32[1,128], index: 2, kind: input, shape index: {}]   ;;  %s303_s3 = inlined_call_operand.vmem [shape: f32[16,128], index: 3, kind: output, shape index: {}]  }
   0x1   :  { %s16_s13 = sshll.u32 %s257_s12, 4  ;;  %s17_s13 = int_to_ptr.vmem [resolvable:$true] %s16_s13 }
   0x2   :  { %s243_s14 = scalar_lea.vmem %s17_s13, 1024  ;;  %p248_p1 = scmp.lt.s32.totalorder %s17_s13, %s17_s13 }
   0x3   :  { %p244_p0 = scmp.ne.s32.totalorder %s17_s13, %s243_s14  ;;  %p249_p2 = scmp.lt.s32.totalorder %s243_s14, %s243_s14 }
   0x5   :  { %p250_p3 = por %p249_p2, %p248_p1 }
   0x7   :  { %p251_p4 = pnand %p250_p3, %p244_p0 }
   0x9   :  { %254 = shalt.err (!%p251_p4)
}
   0xa   :  { %s258_s15 = smov 64   ;;  %s259_s16 = smov 4  }
   0xb   :  { %22 = dma.hbm_to_vmem [thread:$0]  %s301_s1, 1024, %s17_s13, [#allocation4], %s258_s15, %s258_s15, %s259_s16  }
   0xc   :  { %255 = dma.done.wait [#allocation4], 1024  }
   0xd   :  { %256 = vsyncadd [#allocation4], 4294966272  ;;  %v260_v0 = vmov 0.0   ;;  %vm261_vm0 = vmmov 0   ;;  %v227_v1 = vld [vmem:[#allocation3 + $0x38] sm:$0xff]   ;;  %v228_v2 = vld [vmem:[#allocation3 + $0x30] sm:$0xff]  }
   0xe   :  { %202 = vmatprep.subr.bf16.mxu0 %v260_v0  ;;  %218 = vmatprep.mubr.msk.bf16.mxu0 %vm261_vm0, %v260_v0  ;;  %v229_v3 = vld [vmem:[#allocation3 + $0x28] sm:$0xff]   ;;  %v230_v4 = vld [vmem:[#allocation3 + $0x20] sm:$0xff]   ;;  %v231_v5 = vld [vmem:[#allocation3 + $0x18] sm:$0xff]  }
   0xf   :  { %203 = vmatpush3.bf16.msra.mxu0 %v227_v1  ;;  %v232_v6 = vld [vmem:[#allocation3 + $0x10] sm:$0xff]   ;;  %v233_v7 = vld [vmem:[#allocation3 + $0x8] sm:$0xff]   ;;  %v234_v8 = vld [vmem:[#allocation3] sm:$0xff]  }
  0x10   :  { %204 = vmatprep.subr.bf16.mxu0 %v260_v0  ;;  %v29_v9 = vld [vmem:[%s300_s0] sm:$0xff]  ;;  %v30_v10 = vld [vmem:[%s300_s0 + $0x8] sm:$0xff] }
  0x11   :  { %v31_v11 = vpack.c.bf16 %v30_v10, %v29_v9  ;;  %v192_v13 = vld [vmem:[%s302_s2] ss:$0 sm:$0xff] }
  0x13   :  { %205 = vmatpush3.bf16.msra.mxu0 %v228_v2 }
  0x14   :  { %206 = vmatprep.subr.bf16.mxu0 %v260_v0 }
  0x17   :  { %207 = vmatpush3.bf16.msra.mxu0 %v229_v3 }
  0x18   :  { %208 = vmatprep.subr.bf16.mxu0 %v260_v0 }
  0x1b   :  { %209 = vmatpush3.bf16.msra.mxu0 %v230_v4 }
  0x1c   :  { %210 = vmatprep.subr.bf16.mxu0 %v260_v0 }
  0x1f   :  { %211 = vmatpush3.bf16.msra.mxu0 %v231_v5 }
  0x20   :  { %212 = vmatprep.subr.bf16.mxu0 %v260_v0 }
  0x23   :  { %213 = vmatpush3.bf16.msra.mxu0 %v232_v6 }
  0x24   :  { %214 = vmatprep.subr.bf16.mxu0 %v260_v0 }
  0x27   :  { %215 = vmatpush3.bf16.msra.mxu0 %v233_v7 }
  0x28   :  { %216 = vmatprep.subr.bf16.mxu0 %v260_v0 }
  0x2b   :  { %217 = vmatpush3.bf16.msra.mxu0 %v234_v8 }
  0x2e   :  { %219 = vmatmul.mubr.bf16.vlgmr.msra.gmra.mxu0 %v31_v11 }
  0xee   :  { %v130_v12 = vpop.f32.mrf.mxu0 }
  0xef   :  { %v159_v14 = vadd.f32 %v130_v12, %v29_v9 }
  0xf0   :  { %v220_v15 = vpop.f32.mrf.mxu0 }
  0xf1   :  { %v175_v16 = vadd.f32 %v192_v13, %v159_v14 }
  0xf2   :  { %v133_v17 = vpop.f32.mrf.mxu0 }
  0xf3   :  { %177 = vst [vmem:[%s303_s3] sm:$0xff] %v175_v16  ;;  %v160_v18 = vadd.f32 %v133_v17, %v30_v10 }
  0xf4   :  { %v221_v19 = vpop.f32.mrf.mxu0 }
  0xf5   :  { %v176_v20 = vadd.f32 %v192_v13, %v160_v18 }
  0xf7   :  { %178 = vst [vmem:[%s303_s3 + $0x8] sm:$0xff] %v176_v20 }
  0xf8   :  { %183 = vsyncpa [#allocation4], 1 }

</bundles_post_ra>
